<compile_context>
chip_gen: v7x
topology: tpu7x:2x2x1
jax: 0.10.0
libtpu: 0.0.40
codegen_flags: <defaults>
</compile_context>

<pallas_src>
import functools

import jax
import jax.numpy as jnp
from jax.experimental import pallas as pl
from jax.experimental.pallas import tpu as pltpu


def _round_up(x, m):
    return (x + m - 1) // m * m


# "A @ B^T" dimension numbers (contract the last dim of both operands).
_TRANS_B = (((1,), (1,)), ((), ()))


def deepfm_kernel(e_ref, base_ref, w1_ref, b1_ref, w2_ref, b2_ref, w3_ref,
                  out_ref, *, D):
    e = e_ref[...]                                          # (TB, 2D) bf16

    # ---- FactorizationMachine (2 fields, reduce_sum=True) ----
    # 0.5 * sum((e1+e2)^2 - e1^2 - e2^2) == sum(e1 * e2)   (exact identity)
    # Elementwise product kept in f32 (v5e VPU has no bf16).
    prod = e[:, :D].astype(jnp.float32) * e[:, D:].astype(jnp.float32)   # (TB, D)

    # ---- MLP: (Linear + folded eval-BN + ReLU) x 2, bf16 MXU operands, f32 accum ----
    h = jnp.dot(e, w1_ref[...], preferred_element_type=jnp.float32) + b1_ref[...]
    h = jnp.maximum(h, 0.0)
    h = (jnp.dot(h.astype(jnp.bfloat16), w2_ref[...],
                 preferred_element_type=jnp.float32) + b2_ref[...])
    h = jnp.maximum(h, 0.0)                                 # (TB, H2) f32

    # ---- Lane-dense epilogue ----
    # Per-row reductions done as (8,K) x (TB,K)^T dots so the result lands as a
    # (*, TB) lane-dense row (no per-row column stores).  M=8 keeps the MXU path
    # happy; only row 0 is consumed.
    fm8 = jax.lax.dot_general(jnp.ones((8, D), jnp.float32), prod, _TRANS_B,
                              preferred_element_type=jnp.float32)        # (8, TB)
    mlp8 = jax.lax.dot_general(w3_ref[...], h, _TRANS_B,
                               preferred_element_type=jnp.float32)       # (8, TB)

    # base = FeaturesLinear(x) + lin_bias + final_bias, precomputed per row.
    out_ref[...] = base_ref[...] + fm8[0:1, :] + mlp8[0:1, :]            # (1, TB)


def init_params(user_num, item_num, factor_num, mlp_dims, key):
    field_dims = [user_num, item_num]
    vocab = sum(field_dims)
    in_dim = len(field_dims) * factor_num
    dims = [in_dim] + list(mlp_dims)
    eps = 1e-5

    keys = jax.random.split(key, 3 + len(mlp_dims) + 1)
    params = {
        "offsets": jnp.array([0, user_num], dtype=jnp.int32),
        # bf16 storage halves HBM traffic on the dominant gathered-embedding reads.
        "emb_table": (0.01 * jax.random.normal(
            keys[0], (vocab, factor_num), jnp.float32)).astype(jnp.bfloat16),
        "lin_table": 0.01 * jax.random.normal(keys[1], (vocab,), jnp.float32),
        "lin_bias": jnp.zeros((1, 1), jnp.float32),
        "mlp": [],
    }
    # hidden layers: Linear + BatchNorm1d (eval mode, default running stats) + ReLU
    # TODO(synk): Dropout omitted — forward is implemented in inference mode.
    for i, h in enumerate(mlp_dims):
        w = jax.random.normal(keys[2 + i], (dims[i], h), jnp.float32) / jnp.sqrt(dims[i])
        b = jnp.zeros((1, h), jnp.float32)
        # eval-mode BatchNorm with gamma=1, beta=0, mean=0, var=1
        scale = jnp.full((1, h), 1.0 / jnp.sqrt(1.0 + eps), jnp.float32)
        shift = jnp.zeros((1, h), jnp.float32)
        params["mlp"].append((w, b, scale, shift))
    # final Linear(mlp_dims[-1], 1)
    w_out = jax.random.normal(keys[-1], (mlp_dims[-1], 1), jnp.float32) / jnp.sqrt(mlp_dims[-1])
    b_out = jnp.zeros((1, 1), jnp.float32)
    params["out_layer"] = (w_out, b_out)
    return params


def prepare_kernel_params(params):
    """Wrapper-side constant folding: eval-BN and biases folded, bf16 MXU weights."""
    (w1, b1, s1, sh1), (w2, b2, s2, sh2) = params["mlp"]
    w1f = (w1 * s1).astype(jnp.bfloat16)     # (2D, H1) bf16
    b1f = b1 * s1 + sh1                      # (1, H1)  f32
    w2f = (w2 * s2).astype(jnp.bfloat16)     # (H1, H2) bf16
    b2f = b2 * s2 + sh2                      # (1, H2)  f32
    w3, b3 = params["out_layer"]
    return {
        "w1": w1f, "b1": b1f, "w2": w2f, "b2": b2f,
        "w3_rep": jnp.tile(w3.T, (8, 1)),                      # (8, H2) f32
        "base_bias": params["lin_bias"][0, 0] + b3[0, 0],      # folded scalar bias
    }


def deepfm_forward(user, item, params, features=None, logits=True, tile_b=None):
    del features  # unused by the PyTorch module as well
    D = params["emb_table"].shape[1]
    kp = prepare_kernel_params(params)
    H1 = kp["b1"].shape[1]
    H2 = kp["b2"].shape[1]
    B = user.shape[0]

    # ---- batch tile selection ----
    if tile_b is None:
        # Big tiles amortize the ~0.35us/grid-step overhead.  The cap is set by the
        # ~2 KiB/row of lane-padded f32 intermediates the kernel materializes (the
        # HBM stream itself is only ~72 B/row), which keeps the footprint well under
        # v7x's 64 MiB VMEM.  Keep >= 2 grid steps when the batch allows so the
        # "parallel" axis can shard across both v7x TensorCores.
        tile_b = min(8192, _round_up(-(-B // 2), 128))
    TB = max(128, _round_up(tile_b, 128))
    B_pad = _round_up(B, TB)
    G = B_pad // TB

    # ---- wrapper glue (index math + embedding gather stay in XLA) ----
    x = jnp.stack([user, item], axis=1).astype(jnp.int32) + params["offsets"][None, :]
    if B_pad != B:
        # Pad the 4 B/row indices, NOT the 64 B/row gathered embeddings.
        x = jnp.pad(x, ((0, B_pad - B), (0, 0)))
    # TODO(synk): the embedding gather (data-dependent row indexing) is kept as an
    # XLA gather; with 16-element rows a fused per-row DMA gather would be
    # descriptor-overhead bound.
    emb = params["emb_table"][x]                         # (B_pad, 2, D) bf16
    e = emb.reshape(B_pad, 2 * D)                        # contiguous -> no copy
    lin = jnp.sum(params["lin_table"][x], axis=1)        # (B_pad,)  f32
    base = (lin + kp["base_bias"]).reshape(G, 1, TB)     # lane-dense slab

    batch_map = lambda i: (i, 0)
    slab_map = lambda i: (i, 0, 0)
    fixed_map = lambda i: (0, 0)     # weights stay VMEM-resident across the grid

    flops = B_pad * (2 * (2 * D * H1 + H1 * H2) + 3 * D + 2 * H2 + 4)
    bytes_accessed = (B_pad * (2 * D * 2 + 4 + 4)                 # e + base + out
                      + 2 * (2 * D * H1 + H1 * H2)                # bf16 weights
                      + 4 * (H1 + H2 + 8 * H2))                   # biases + w3 rows

    out = pl.pallas_call(
        functools.partial(deepfm_kernel, D=D),
        out_shape=jax.ShapeDtypeStruct((G, 1, TB), jnp.float32),
        grid=(G,),
        in_specs=[
            pl.BlockSpec((TB, 2 * D), batch_map),        # e     (bf16, streamed)
            pl.BlockSpec((None, 1, TB), slab_map),       # base  (f32, lane-dense)
            pl.BlockSpec((2 * D, H1), fixed_map),        # w1    (bf16, resident)
            pl.BlockSpec((1, H1), fixed_map),            # b1    (folded BN)
            pl.BlockSpec((H1, H2), fixed_map),           # w2    (bf16, resident)
            pl.BlockSpec((1, H2), fixed_map),            # b2    (folded BN)
            pl.BlockSpec((8, H2), fixed_map),            # w3 rows (replicated x8)
        ],
        out_specs=pl.BlockSpec((None, 1, TB), slab_map),
        compiler_params=pltpu.CompilerParams(
            dimension_semantics=("parallel",),
            vmem_limit_bytes=48 * 1024 * 1024),
        cost_estimate=pl.CostEstimate(
            flops=flops, transcendentals=0, bytes_accessed=bytes_accessed),
    )(e, base, kp["w1"], kp["b1"], kp["w2"], kp["b2"], kp["w3_rep"])

    out = out.reshape(B_pad)[:B]                         # squeeze(1) -> (B,)
    return out if logits else jax.nn.sigmoid(out)


def deepfm_reference(user, item, params, logits=True):
    """Pure-JAX reference mirroring the PyTorch forward (eval mode), raw f32 params."""
    x = jnp.stack([user, item], axis=1).astype(jnp.int32) + params["offsets"][None, :]
    embed_x = params["emb_table"][x].astype(jnp.float32)   # (B, 2, D)
    B, F, D = embed_x.shape
    lin = jnp.sum(params["lin_table"][x], axis=1, keepdims=True) + params["lin_bias"][0, 0]
    sq_of_sum = jnp.sum(embed_x, axis=1) ** 2
    sum_of_sq = jnp.sum(embed_x ** 2, axis=1)
    fm = 0.5 * jnp.sum(sq_of_sum - sum_of_sq, axis=1, keepdims=True)
    h = embed_x.reshape(B, F * D)
    for (w, b, scale, shift) in params["mlp"]:
        h = (h @ w + b) * scale + shift
        h = jnp.maximum(h, 0.0)
    w3, b3 = params["out_layer"]
    out = (lin + fm + h @ w3 + b3)[:, 0]
    return out if logits else jax.nn.sigmoid(out)


if __name__ == "__main__":
    user_num, item_num = 32, 48
    factor_num = 16
    mlp_dims = (32, 16)
    dropout = 0.2  # unused at inference
    B = 300        # exercises index padding (B_pad=512), a 2-step grid, default tiling

    key = jax.random.PRNGKey(0)
    k_params, k_user, k_item = jax.random.split(key, 3)
    params = init_params(user_num, item_num, factor_num, mlp_dims, k_params)

    user = jax.random.randint(k_user, (B,), 0, user_num, dtype=jnp.int32)
    item = jax.random.randint(k_item, (B,), 0, item_num, dtype=jnp.int32)

    out = deepfm_forward(user, item, params, logits=True)
    out = jax.block_until_ready(out)

    ref = deepfm_reference(user, item, params, logits=True)
    assert out.shape == (B,)
    # bf16 folded weights in the kernel vs. f32 reference weights -> bf16-level tolerance.
    assert jnp.allclose(out, ref, atol=1e-3, rtol=2e-2), (out, ref)

    print("KERNEL_OK")
</pallas_src>

<mosaic_0001>
module attributes {stable_mosaic.version = 11 : i64} {
  func.func @deepfm_kernel(%arg0: i32, %arg1: memref<256x32xbf16, #tpu.memory_space<vmem>>, %arg2: memref<1x1x256xf32, #tpu.memory_space<vmem>>, %arg3: memref<32x32xbf16, #tpu.memory_space<vmem>>, %arg4: memref<1x32xf32, #tpu.memory_space<vmem>>, %arg5: memref<32x16xbf16, #tpu.memory_space<vmem>>, %arg6: memref<1x16xf32, #tpu.memory_space<vmem>>, %arg7: memref<8x16xf32, #tpu.memory_space<vmem>>, %arg8: memref<1x1x256xf32, #tpu.memory_space<vmem>>) attributes {dimension_semantics = [#tpu.dimension_semantics<parallel>], iteration_bounds = array<i64: 2>, scalar_prefetch = 0 : i64, scratch_operands = 0 : i64, tpu.core_type = #tpu.core_type<tc>, window_params = [{transform_indices = @transform_0, window_bounds = array<i64: 256, 32>}, {transform_indices = @transform_1, window_bounds = array<i64: 1, 1, 256>}, {pipeline_mode = #tpu.pipeline_mode<synchronous>, transform_indices = @transform_2, window_bounds = array<i64: 32, 32>}, {pipeline_mode = #tpu.pipeline_mode<synchronous>, transform_indices = @transform_3, window_bounds = array<i64: 1, 32>}, {pipeline_mode = #tpu.pipeline_mode<synchronous>, transform_indices = @transform_4, window_bounds = array<i64: 32, 16>}, {pipeline_mode = #tpu.pipeline_mode<synchronous>, transform_indices = @transform_5, window_bounds = array<i64: 1, 16>}, {pipeline_mode = #tpu.pipeline_mode<synchronous>, transform_indices = @transform_6, window_bounds = array<i64: 8, 16>}, {transform_indices = @transform_7, window_bounds = array<i64: 1, 1, 256>}]} {
    %c0 = arith.constant 0 : index
    %c0_0 = arith.constant 0 : index
    %0 = vector.load %arg1[%c0, %c0_0] : memref<256x32xbf16, #tpu.memory_space<vmem>>, vector<256x32xbf16>
    %1 = vector.extract_strided_slice %0 {offsets = [0, 0], sizes = [256, 16], strides = [1, 1]} : vector<256x32xbf16> to vector<256x16xbf16>
    %2 = arith.extf %1 : vector<256x16xbf16> to vector<256x16xf32>
    %3 = vector.extract_strided_slice %0 {offsets = [0, 16], sizes = [256, 16], strides = [1, 1]} : vector<256x32xbf16> to vector<256x16xbf16>
    %4 = arith.extf %3 : vector<256x16xbf16> to vector<256x16xf32>
    %5 = arith.mulf %2, %4 : vector<256x16xf32>
    %c0_1 = arith.constant 0 : index
    %c0_2 = arith.constant 0 : index
    %6 = vector.load %arg3[%c0_1, %c0_2] : memref<32x32xbf16, #tpu.memory_space<vmem>>, vector<32x32xbf16>
    %cst = arith.constant dense<0.000000e+00> : vector<256x32xf32>
    %7 = tpu.matmul %0, %6, %cst {dimension_numbers = #tpu.dot_dimension_numbers<[1], [0], [0], [1], [0, 0, 1, 1], [], []>} : vector<256x32xbf16>, vector<32x32xbf16>, vector<256x32xf32> -> vector<256x32xf32>
    %c0_3 = arith.constant 0 : index
    %c0_4 = arith.constant 0 : index
    %8 = vector.load %arg4[%c0_3, %c0_4] : memref<1x32xf32, #tpu.memory_space<vmem>>, vector<1x32xf32>
    %9 = vector.broadcast %8 : vector<1x32xf32> to vector<256x32xf32>
    %10 = arith.addf %7, %9 : vector<256x32xf32>
    %cst_5 = arith.constant 0.000000e+00 : f32
    %11 = vector.broadcast %cst_5 : f32 to vector<256x32xf32>
    %12 = arith.maximumf %10, %11 : vector<256x32xf32>
    %13 = arith.truncf %12 : vector<256x32xf32> to vector<256x32xbf16>
    %c0_6 = arith.constant 0 : index
    %c0_7 = arith.constant 0 : index
    %14 = vector.load %arg5[%c0_6, %c0_7] : memref<32x16xbf16, #tpu.memory_space<vmem>>, vector<32x16xbf16>
    %cst_8 = arith.constant dense<0.000000e+00> : vector<256x16xf32>
    %15 = tpu.matmul %13, %14, %cst_8 {dimension_numbers = #tpu.dot_dimension_numbers<[1], [0], [0], [1], [0, 0, 1, 1], [], []>} : vector<256x32xbf16>, vector<32x16xbf16>, vector<256x16xf32> -> vector<256x16xf32>
    %c0_9 = arith.constant 0 : index
    %c0_10 = arith.constant 0 : index
    %16 = vector.load %arg6[%c0_9, %c0_10] : memref<1x16xf32, #tpu.memory_space<vmem>>, vector<1x16xf32>
    %17 = vector.broadcast %16 : vector<1x16xf32> to vector<256x16xf32>
    %18 = arith.addf %15, %17 : vector<256x16xf32>
    %cst_11 = arith.constant 0.000000e+00 : f32
    %19 = vector.broadcast %cst_11 : f32 to vector<256x16xf32>
    %20 = arith.maximumf %18, %19 : vector<256x16xf32>
    %cst_12 = arith.constant 1.000000e+00 : f32
    %21 = vector.broadcast %cst_12 : f32 to vector<8x16xf32>
    %cst_13 = arith.constant dense<0.000000e+00> : vector<8x256xf32>
    %22 = tpu.matmul %21, %5, %cst_13 {dimension_numbers = #tpu.dot_dimension_numbers<[1], [1], [0], [0], [0, 0, 1, 0], [], []>} : vector<8x16xf32>, vector<256x16xf32>, vector<8x256xf32> -> vector<8x256xf32>
    %c0_14 = arith.constant 0 : index
    %c0_15 = arith.constant 0 : index
    %23 = vector.load %arg7[%c0_14, %c0_15] : memref<8x16xf32, #tpu.memory_space<vmem>>, vector<8x16xf32>
    %cst_16 = arith.constant dense<0.000000e+00> : vector<8x256xf32>
    %24 = tpu.matmul %23, %20, %cst_16 {dimension_numbers = #tpu.dot_dimension_numbers<[1], [1], [0], [0], [0, 0, 1, 0], [], []>} : vector<8x16xf32>, vector<256x16xf32>, vector<8x256xf32> -> vector<8x256xf32>
    %c0_17 = arith.constant 0 : index
    %c0_18 = arith.constant 0 : index
    %c0_19 = arith.constant 0 : index
    %25 = vector.load %arg2[%c0_17, %c0_18, %c0_19] : memref<1x1x256xf32, #tpu.memory_space<vmem>>, vector<1x1x256xf32>
    %26 = vector.shape_cast %25 : vector<1x1x256xf32> to vector<1x256xf32>
    %27 = vector.extract_strided_slice %22 {offsets = [0, 0], sizes = [1, 256], strides = [1, 1]} : vector<8x256xf32> to vector<1x256xf32>
    %28 = arith.addf %26, %27 : vector<1x256xf32>
    %29 = vector.extract_strided_slice %24 {offsets = [0, 0], sizes = [1, 256], strides = [1, 1]} : vector<8x256xf32> to vector<1x256xf32>
    %30 = arith.addf %28, %29 : vector<1x256xf32>
    %c0_20 = arith.constant 0 : index
    %c0_21 = arith.constant 0 : index
    %c0_22 = arith.constant 0 : index
    %31 = vector.load %arg8[%c0_20, %c0_21, %c0_22] : memref<1x1x256xf32, #tpu.memory_space<vmem>>, vector<1x1x256xf32>
    %32 = vector.shape_cast %31 : vector<1x1x256xf32> to vector<1x256xf32>
    %33 = vector.shape_cast %30 : vector<1x256xf32> to vector<1x1x256xf32>
    tpu.vector_store %arg8[%c0_20, %c0_21, %c0_22], %33 {strides = array<i32>} : memref<1x1x256xf32, #tpu.memory_space<vmem>>, vector<1x1x256xf32>,
    return
  }
  func.func @transform_0(%arg0: i32) -> (i32, i32) {
    %c0_i32 = arith.constant 0 : i32
    %c0_i32_0 = arith.constant 0 : i32
    return %arg0, %c0_i32 : i32, i32
  }
  func.func @transform_1(%arg0: i32) -> (i32, i32, i32) {
    %c0_i32 = arith.constant 0 : i32
    %c0_i32_0 = arith.constant 0 : i32
    %c0_i32_1 = arith.constant 0 : i32
    return %arg0, %c0_i32, %c0_i32_0 : i32, i32, i32
  }
  func.func @transform_2(%arg0: i32) -> (i32, i32) {
    %c0_i32 = arith.constant 0 : i32
    %c0_i32_0 = arith.constant 0 : i32
    %c0_i32_1 = arith.constant 0 : i32
    return %c0_i32, %c0_i32_0 : i32, i32
  }
  func.func @transform_3(%arg0: i32) -> (i32, i32) {
    %c0_i32 = arith.constant 0 : i32
    %c0_i32_0 = arith.constant 0 : i32
    %c0_i32_1 = arith.constant 0 : i32
    return %c0_i32, %c0_i32_0 : i32, i32
  }
  func.func @transform_4(%arg0: i32) -> (i32, i32) {
    %c0_i32 = arith.constant 0 : i32
    %c0_i32_0 = arith.constant 0 : i32
    %c0_i32_1 = arith.constant 0 : i32
    return %c0_i32, %c0_i32_0 : i32, i32
  }
  func.func @transform_5(%arg0: i32) -> (i32, i32) {
    %c0_i32 = arith.constant 0 : i32
    %c0_i32_0 = arith.constant 0 : i32
    %c0_i32_1 = arith.constant 0 : i32
    return %c0_i32, %c0_i32_0 : i32, i32
  }
  func.func @transform_6(%arg0: i32) -> (i32, i32) {
    %c0_i32 = arith.constant 0 : i32
    %c0_i32_0 = arith.constant 0 : i32
    %c0_i32_1 = arith.constant 0 : i32
    return %c0_i32, %c0_i32_0 : i32, i32
  }
  func.func @transform_7(%arg0: i32) -> (i32, i32, i32) {
    %c0_i32 = arith.constant 0 : i32
    %c0_i32_0 = arith.constant 0 : i32
    %c0_i32_1 = arith.constant 0 : i32
    return %arg0, %c0_i32, %c0_i32_0 : i32, i32, i32
  }
}

</mosaic_0001>

<bundles_post_ra>
// kernel: tpu_custom_call.1
= control target key start
LH: loop header
LB: loop body
LE: loop exit
PB: predicated region body
PF: predicated region fallthrough
CT: control target
= control target key end

     0   :  { %12 = vsyncpa [#allocation3], 0  ;;  %s2863_s0 = inlined_call_operand.vmem [shape: bf16[512,32], index: 0, kind: input, shape index: {}]   ;;  %s2864_s1 = inlined_call_operand.vmem [shape: f32[2,1,256], index: 1, kind: input, shape index: {}]   ;;  %s2865_s2 = inlined_call_operand.vmem [shape: bf16[32,32], index: 2, kind: input, shape index: {}]   ;;  %s2866_s3 = inlined_call_operand.vmem [shape: f32[1,32], index: 3, kind: input, shape index: {}]   ;;  %s2867_s4 = inlined_call_operand.vmem [shape: bf16[32,16], index: 4, kind: input, shape index: {}]   ;;  %s2868_s5 = inlined_call_operand.vmem [shape: f32[1,16], index: 5, kind: input, shape index: {}]   ;;  %s2869_s6 = inlined_call_operand.vmem [shape: f32[8,16], index: 6, kind: input, shape index: {}]   ;;  %s2870_s7 = inlined_call_operand.hbm [shape: f32[2,1,256], index: 7, kind: output, shape index: {}]  }
   0x1   :  { %14 = vsyncpa [#allocation3 + $0x1], 0  ;;  %s2290_s24 = smov 0   ;;  %s2292_s25 = smov 0  }
   0x2   :  { %s2294_s26 = smov 0   ;;  %s2296_s27 = smov 0  }
   0x3 LB: > { %s2311_s28 = sadd.s32 4294967295, %s2244_s27   ;;  %s1618_s29 = sadd.s32 4294967294, %s2244_s27   ;;  %s2244_s27 = sphi %s2296_s27, %s2884_s27   ;;  %s2240_s26 = sphi %s2294_s26, %s2883_s26   ;;  %s2236_s25 = sphi %s2292_s25, %s2882_s25   ;;  %s2232_s24 = sphi %s2290_s24, %s2881_s24  }
   0x4   : > { %s2315_s30 = sadd.s32 1, %s2244_s27   ;;  %s184_s8 = sadd.s32 1, %s2240_s26 }
   0x5   : > { %s181_s9 = ssub.s32 %s2244_s27, %s2315_s30  ;;  %p194_p0 = scmp.ne.s32.totalorder %s2240_s26, %s2236_s25 }
   0x6   : > { %p182_p1 = scmp.eq.s32.totalorder %s181_s9, 0  ;;  %p195_p2 = scmp.eq.s32.totalorder %s2311_s28, 1 }
   0x7   : > { %p200_p3 = scmp.ne.s32.totalorder %s2236_s25, %s2232_s24  ;;  %p201_p4 = scmp.eq.s32.totalorder %s1618_s29, 1 }
   0x8   : > { %s2326_s10 = scalar_select %p182_p1, %s2240_s26, %s184_s8  }
   0x9   : > { %p2328_p5 = por %p195_p2, %p194_p0  ;;  %p2332_p6 = por %p201_p4, %p200_p3 }
   0xa   : > { %p1621_p7 = scmp.ge.s32.totalorder %s2244_s27, 1  ;;  %p250_p8 = scmp.lt.s32.totalorder %s2244_s27, 3 }
   0xc   : > { %p251_p9 = pnand %p1621_p7, %p250_p8 }
   0xd   : > { %v2146_v0 = vld [vmem:[%s2865_s2] sm:$0xff] (!%p251_p9)   ;;  %s2342_s15 = sshll.u32 (!%p251_p9), %s2311_s28, 5  ;;  %v2147_v1 = vld [vmem:[%s2865_s2 + $0x8] sm:$0xff] (!%p251_p9)   ;;  %vm624_vm0 = vcmask (!%p251_p9), 261120   ;;  %s2246_s13 = smov (!%p251_p9), 112   ;;  %vm1146_vm1 = vcmask (!%p251_p9), 130048  }
   0xe   : > { %254 = sbr.rel (%p251_p9) target bundleno = 801 (0x321), region = 48  ;;  %p287_p10 = scmp.lt.s32.totalorder (!%p251_p9), %s2342_s15, 63  ;;  %1856 = vmatprep.subr.bf16.mxu0 (!%p251_p9), %v2146_v0  ;;  %v2164_v18 = vld [vmem:[%s2867_s4] sm:$0xff] (!%p251_p9)   ;;  %v2165_v19 = vld [vmem:[%s2867_s4 + $0x8] sm:$0xff] (!%p251_p9)   ;;  %vm2615_vm2 = vmpackc.low (!%p251_p9), %vm1146_vm1, %vm1146_vm1 }
   0xf   : > { %1857 = vmatpush3.bf16.msra.mxu0 (!%p251_p9), %v2146_v0  ;;  %1892 = vmatprep.subr.bf16.mxu1 (!%p251_p9), %v2164_v18  ;;  %p292_p11 = scmp.lt.s32.totalorder (!%p251_p9), %s2311_s28, 1  ;;  %s2821_s17 = scalar_lea.hbm (!%p251_p9), %s2870_s7, %s2342_s15 }
  0x10   : > { %1858 = vmatprep.subr.bf16.mxu0 (!%p251_p9), %v2147_v1  ;;  %1893 = vmatpush3.bf16.msra.mxu1 (!%p251_p9), %v2164_v18  ;;  %s2249_s20 = smov (!%p251_p9), [#allocation2]  }
  0x11   : > { %1894 = vmatprep.subr.bf16.mxu1 (!%p251_p9), %v2165_v19 }
  0x13   : > { %1859 = vmatpush3.bf16.msra.mxu0 (!%p251_p9), %v2147_v1 }
  0x14   : > { %1895 = vmatpush3.bf16.msra.mxu1 (!%p251_p9), %v2165_v19 }
  0x15   : > { %s288_s18 = scalar_select %p287_p10, %s2342_s15, 63 }
  0x16   : > { %s2886_s28 = smov (!%p292_p11, %s2311_s28), 1 }
  0x17   : > { %s1624_s19 = sshll.u32 %s288_s18, 2  ;;  %s1625_s21 = sshll.u32 %s2886_s28, 1 }
  0x18   : > { %s2352_s22 = scalar_lea.vmem %s2863_s0, %s1624_s19  ;;  %s295_s8 = scalar_lea.vmem %s2864_s1, %s1625_s21 }
  0x19   : > { %v2355_v2 = vld [vmem:[%s2352_s22] sm:$0xff]   ;;  %v2358_v3 = vld [vmem:[%s2352_s22 + $0x8] sm:$0xff]   ;;  %v2361_v4 = vld [vmem:[%s2352_s22 + $0x10] sm:$0xff]   ;;  %s2186_s21 = sshll.u32 %s2249_s20, 4  ;;  %s2187_s21 = int_to_ptr.vmem [resolvable:$false] %s2186_s21 }
  0x1a   : > { %1860 = vmatprep.mubr.msk.bf16.mxu0 %vm624_vm0, %v2355_v2  ;;  %v2370_v5 = vld [vmem:[%s2352_s22 + $0x18] sm:$0xff]   ;;  %v2373_v6 = vld [vmem:[%s2352_s22 + $0x20] sm:$0xff]   ;;  %v2380_v7 = vld [vmem:[%s2352_s22 + $0x28] sm:$0xff]   ;;  %v329_v20 = vunpack.c.l.bf16 %v2355_v2  ;;  %v330_v21 = vunpack.c.h.bf16 %v2355_v2  ;;  %v331_v26 = vunpack.c.l.bf16 %v2358_v3  ;;  %v332_v27 = vunpack.c.h.bf16 %v2358_v3  ;;  %s2188_s23 = scalar_lea.vmem %s2187_s21, 64 }
  0x1b   : > { %1861 = vmatmul.mubr.msk.bf16.vlgmr.msra.gmra.mrb[0].mxu0 %vm624_vm0, %v2358_v3  ;;  %v2383_v8 = vld [vmem:[%s2352_s22 + $0x30] sm:$0xff]   ;;  %v2390_v9 = vld [vmem:[%s2352_s22 + $0x38] sm:$0xff]   ;;  %v2393_v10 = vld [vmem:[%s2352_s22 + $0x40] sm:$0xff]   ;;  %v333_v34 = vunpack.c.l.bf16 %v2361_v4  ;;  %v334_v35 = vunpack.c.h.bf16 %v2361_v4  ;;  %v335_v40 = vunpack.c.l.bf16 %v2370_v5  ;;  %v336_v41 = vunpack.c.h.bf16 %v2370_v5 }
  0x1c   : > { %1864 = vmatprep.mubr.msk.bf16.mxu0 %vm624_vm0, %v2361_v4  ;;  %v2400_v11 = vld [vmem:[%s2352_s22 + $0x48] sm:$0xff]   ;;  %v2403_v12 = vld [vmem:[%s2352_s22 + $0x50] sm:$0xff]   ;;  %v2410_v13 = vld [vmem:[%s2352_s22 + $0x58] sm:$0xff]   ;;  %v345_v22 = vunpack.c.l.bf16 %v2393_v10  ;;  %v346_v23 = vunpack.c.h.bf16 %v2393_v10  ;;  %v2071_v30 = vpack.i.bf16 %v330_v21, %v329_v20  ;;  %v2081_v33 = vpack.i.bf16 %v332_v27, %v331_v26 }
  0x1d   : > { %v2413_v14 = vld [vmem:[%s2352_s22 + $0x60] sm:$0xff]   ;;  %v2420_v15 = vld [vmem:[%s2352_s22 + $0x68] sm:$0xff]   ;;  %v2423_v16 = vld [vmem:[%s2352_s22 + $0x70] sm:$0xff]   ;;  %v347_v24 = vunpack.c.l.bf16 %v2400_v11  ;;  %v348_v25 = vunpack.c.h.bf16 %v2400_v11  ;;  %v349_v31 = vunpack.c.l.bf16 %v2403_v12  ;;  %v350_v32 = vunpack.c.h.bf16 %v2403_v12 }
  0x1e   : > { %v2430_v17 = vld [vmem:[%s2352_s22 + $0x78] sm:$0xff]   ;;  %v2066_v28 = vpack.i.bf16 %v346_v23, %v345_v22  ;;  %v351_v37 = vunpack.c.l.bf16 %v2410_v13  ;;  %v352_v38 = vunpack.c.h.bf16 %v2410_v13  ;;  %v2091_v39 = vpack.i.bf16 %v334_v35, %v333_v34  ;;  %s283_s22 = sand.u32 1, %s2236_s25  }
  0x1f   : > { %v2076_v29 = vpack.i.bf16 %v348_v25, %v347_v24  ;;  %v2086_v36 = vpack.i.bf16 %v350_v32, %v349_v31  ;;  %v353_v43 = vunpack.c.l.bf16 %v2413_v14  ;;  %v354_v44 = vunpack.c.h.bf16 %v2413_v14  ;;  %s1622_s9 = sshll.u32 %s283_s22, 1  ;;  %s1533_s18 = scalar_lea.sflag [#allocation3], %s283_s22 }
  0x20   : > { %2067 = vrot.lane.b32.xlu0 %v2066_v28, %s2246_s13  ;;  %v2096_v42 = vpack.i.bf16 %v352_v38, %v351_v37  ;;  %v2101_v45 = vpack.i.bf16 %v336_v41, %v335_v40  ;;  %v337_v46 = vunpack.c.l.bf16 %v2373_v6  ;;  %v338_v47 = vunpack.c.h.bf16 %v2373_v6  ;;  %v2555_v28 = vld [vmem:[%s2866_s3] ss:$0 sm:$0xff] }
  0x21   : > { %2077 = vrot.lane.b32.xlu1 %v2076_v29, %s2246_s13  ;;  %v2106_v48 = vpack.i.bf16 %v354_v44, %v353_v43  ;;  %v355_v49 = vunpack.c.l.bf16 %v2420_v15  ;;  %v356_v50 = vunpack.c.h.bf16 %v2420_v15  ;;  %v339_v52 = vunpack.c.l.bf16 %v2380_v7 }
  0x22   : > { %v2111_v51 = vpack.i.bf16 %v338_v47, %v337_v46  ;;  %v340_v53 = vunpack.c.h.bf16 %v2380_v7  ;;  %v357_v55 = vunpack.c.l.bf16 %v2423_v16  ;;  %v358_v56 = vunpack.c.h.bf16 %v2423_v16 }
  0x23   : > { %1865 = vmatmul.mubr.msk.bf16.gmra.mrb[4].mxu0 %vm624_vm0, %v2370_v5  ;;  %v2116_v54 = vpack.i.bf16 %v356_v50, %v355_v49  ;;  %v341_v58 = vunpack.c.l.bf16 %v2383_v8  ;;  %v342_v59 = vunpack.c.h.bf16 %v2383_v8  ;;  %v2873_v61 = vunpack.c.l.bf16 %v2430_v17 }
  0x24   : > { %1868 = vmatprep.mubr.msk.bf16.mxu0 %vm624_vm0, %v2373_v6  ;;  %2072 = vrot.lane.b32.xlu0 %v2071_v30, %s2246_s13  ;;  %v2121_v57 = vpack.i.bf16 %v340_v53, %v339_v52  ;;  %v2126_v60 = vpack.i.bf16 %v358_v56, %v357_v55  ;;  %v360_v62 = vunpack.c.h.bf16 %v2430_v17  ;;  %v2871_v0 = vunpack.c.l.bf16 %v2390_v9 }
  0x25   : > { %2082 = vrot.lane.b32.xlu1 %v2081_v33, %s2246_s13  ;;  %v2131_v63 = vpack.i.bf16 %v342_v59, %v341_v58  ;;  %v2872_v1 = vunpack.c.h.bf16 %v2390_v9 }
  0x26   : > { %v2136_v18 = vpack.i.bf16 %v360_v62, %v2873_v61 }
  0x27   : > { %v2141_v19 = vpack.i.bf16 %v2872_v1, %v2871_v0 }
  0x28   : > { %2087 = vrot.lane.b32.xlu0 %v2086_v36, %s2246_s13 }
  0x29   : > { %2092 = vrot.lane.b32.xlu1 %v2091_v39, %s2246_s13 }
  0x2b   : > { %1869 = vmatmul.mubr.msk.bf16.gmra.mrb[8].mxu0 %vm624_vm0, %v2380_v7 }
  0x2c   : > { %1872 = vmatprep.mubr.msk.bf16.mxu0 %vm624_vm0, %v2383_v8  ;;  %2097 = vrot.lane.b32.xlu0 %v2096_v42, %s2246_s13  ;;  %v2879_v8 = vunpack.c.h.bf16 %v2390_v9 }
  0x2d   : > { %2102 = vrot.lane.b32.xlu1 %v2101_v45, %s2246_s13 }
  0x30   : > { %2107 = vrot.lane.b32.xlu0 %v2106_v48, %s2246_s13 }
  0x31   : > { %2112 = vrot.lane.b32.xlu1 %v2111_v51, %s2246_s13 }
  0x33   : > { %1873 = vmatmul.mubr.msk.bf16.gmra.mrb[12].mxu0 %vm624_vm0, %v2390_v9 }
  0x34   : > { %1876 = vmatprep.mubr.msk.bf16.mxu0 %vm624_vm0, %v2393_v10  ;;  %2117 = vrot.lane.b32.xlu0 %v2116_v54, %s2246_s13 }
  0x35   : > { %2122 = vrot.lane.b32.xlu1 %v2121_v57, %s2246_s13 }
  0x38   : > { %2127 = vrot.lane.b32.xlu0 %v2126_v60, %s2246_s13 }
  0x39   : > { %2132 = vrot.lane.b32.xlu1 %v2131_v63, %s2246_s13 }
  0x3b   : > { %1877 = vmatmul.mubr.msk.bf16.gmra.mrb[16].mxu0 %vm624_vm0, %v2400_v11 }
  0x3c   : > { %1880 = vmatprep.mubr.msk.bf16.mxu0 %vm624_vm0, %v2403_v12  ;;  %2137 = vrot.lane.b32.xlu0 %v2136_v18, %s2246_s13 }
  0x3d   : > { %2142 = vrot.lane.b32.xlu1 %v2141_v19, %s2246_s13  ;;  %s285_s13 = scalar_lea.vmem [#allocation2], %s1622_s9 }
  0x3e   : > { %s1547_s14 = sshll.u32 %s285_s13, 4  ;;  %s2823_s14 = int_to_ptr.vmem [resolvable:$true] %s1547_s14 }
  0x3f   : > { %s2182_s19 = scalar_lea.vmem %s2823_s14, 32  ;;  %p2189_p1 = scmp.lt.s32.totalorder %s2823_s14, %s2187_s21 }
  0x40   : > { %p2183_p12 = scmp.ne.s32.totalorder %s2823_s14, %s2182_s19  ;;  %p2190_p2 = scmp.lt.s32.totalorder %s2188_s23, %s2182_s19 }
  0x42   : > { %p2184_p13 = pnand %p2183_p12, %p2328_p5  ;;  %p2191_p3 = por %p2190_p2, %p2189_p1 }
  0x43   : > { %1881 = vmatmul.mubr.msk.bf16.gmra.mrb[20].mxu0 %vm624_vm0, %v2410_v13 }
  0x44   : > { %1884 = vmatprep.mubr.msk.bf16.mxu0 %vm624_vm0, %v2413_v14  ;;  %p2185_p0 = pneg %p2184_p13 }
  0x46   : > { %p2192_p4 = pnand %p2191_p3, %p2185_p0 }
  0x4b   : > { %1885 = vmatmul.mubr.msk.bf16.gmra.mrb[24].mxu0 %vm624_vm0, %v2420_v15 }
  0x4c   : > { %1888 = vmatprep.mubr.msk.bf16.mxu0 %vm624_vm0, %v2423_v16 }
  0x53   : > { %1889 = vmatmul.mubr.msk.bf16.gmra.mrb[28].mxu0 %vm624_vm0, %v2430_v17 }
  0x93   : > { %v2078_v10 = vpop.permute.xlu1 %2077 }
  0xee   : > { %v1862_v29 = vpop.f32.mrb[0].mxu0 }
  0xef   : > { %v716_v30 = vadd.f32 %v1862_v29, %v2555_v28  ;;  %v707_v33 = vpop.f32.mrb[1].mxu0 }
  0xf0   : > { %v708_v36 = vadd.f32 %v2555_v28, %v707_v33  ;;  %v1863_v39 = vpop.f32.mrb[2].mxu0 }
  0xf1   : > { %v719_v42 = vadd.f32 %v1863_v39, %v2555_v28  ;;  %v710_v45 = vpop.f32.mrb[3].mxu0  ;;  %v836_v51 = vmax.f32 %v716_v30, 0.0 }
  0xf2   : > { %v711_v48 = vadd.f32 %v2555_v28, %v710_v45  ;;  %v834_v57 = vmax.f32 %v708_v36, 0.0 }
  0xf3   : > { %v837_v54 = vmax.f32 %v719_v42, 0.0 }
  0xf4   : > { %v835_v60 = vmax.f32 %v711_v48, 0.0 }
  0xf5   : > { %v867_v63 = vpack.c.bf16 %v837_v54, %v836_v51 }
  0xf6   : > { %v1866_v18 = vpop.f32.mrb[4].mxu0  ;;  %v866_v19 = vpack.c.bf16 %v835_v60, %v834_v57 }
  0xf7   : > { %v732_v0 = vadd.f32 %v1866_v18, %v2555_v28  ;;  %v723_v1 = vpop.f32.mrb[5].mxu0 }
  0xf8   : > { %v724_v29 = vadd.f32 %v2555_v28, %v723_v1  ;;  %v1867_v61 = vpop.f32.mrb[6].mxu0  ;;  %1896 = vmatprep.mubr.msk.bf16.mxu1 %vm624_vm0, %v866_v19 }
  0xf9   : > { %v735_v33 = vadd.f32 %v1867_v61, %v2555_v28  ;;  %v726_v39 = vpop.f32.mrb[7].mxu0  ;;  %1897 = vmatmul.mubr.msk.bf16.vlgmr.msra.gmra.mrb[0].mxu1 %vm624_vm0, %v867_v63  ;;  %v840_v36 = vmax.f32 %v732_v0, 0.0 }
  0xfa   : > { %v727_v30 = vadd.f32 %v2555_v28, %v726_v39  ;;  %v838_v45 = vmax.f32 %v724_v29, 0.0 }
  0xfb   : > { %v841_v42 = vmax.f32 %v735_v33, 0.0 }
  0xfc   : > { %v839_v48 = vmax.f32 %v727_v30, 0.0 }
  0xfd   : > { %v869_v51 = vpack.c.bf16 %v841_v42, %v840_v36 }
  0xfe   : > { %v868_v54 = vpack.c.bf16 %v839_v48, %v838_v45  ;;  %v1870_v57 = vpop.f32.mrb[8].mxu0 }
  0xff   : > { %v748_v60 = vadd.f32 %v1870_v57, %v2555_v28  ;;  %v739_v1 = vpop.f32.mrb[9].mxu0 }
 0x100   : > { %v740_v18 = vadd.f32 %v2555_v28, %v739_v1  ;;  %v1871_v19 = vpop.f32.mrb[10].mxu0  ;;  %1900 = vmatprep.mubr.msk.bf16.mxu1 %vm624_vm0, %v868_v54 }
 0x101   : > { %v751_v61 = vadd.f32 %v1871_v19, %v2555_v28  ;;  %v742_v63 = vpop.f32.mrb[11].mxu0  ;;  %1901 = vmatmul.mubr.msk.bf16.gmra.mrb[4].mxu1 %vm624_vm0, %v869_v51  ;;  %v844_v29 = vmax.f32 %v748_v60, 0.0 }
 0x102   : > { %v743_v0 = vadd.f32 %v2555_v28, %v742_v63  ;;  %v842_v39 = vmax.f32 %v740_v18, 0.0 }
 0x103   : > { %v845_v33 = vmax.f32 %v751_v61, 0.0 }
 0x104   : > { %v843_v30 = vmax.f32 %v743_v0, 0.0 }
 0x105   : > { %v871_v36 = vpack.c.bf16 %v845_v33, %v844_v29 }
 0x106   : > { %v870_v42 = vpack.c.bf16 %v843_v30, %v842_v39  ;;  %v1874_v45 = vpop.f32.mrb[12].mxu0 }
 0x107   : > { %v764_v48 = vadd.f32 %v1874_v45, %v2555_v28  ;;  %v755_v57 = vpop.f32.mrb[13].mxu0 }
 0x108   : > { %v756_v1 = vadd.f32 %v2555_v28, %v755_v57  ;;  %v1875_v54 = vpop.f32.mrb[14].mxu0  ;;  %1904 = vmatprep.mubr.msk.bf16.mxu1 %vm624_vm0, %v870_v42 }
 0x109   : > { %v767_v19 = vadd.f32 %v1875_v54, %v2555_v28  ;;  %v758_v51 = vpop.f32.mrb[15].mxu0  ;;  %1905 = vmatmul.mubr.msk.bf16.gmra.mrb[8].mxu1 %vm624_vm0, %v871_v36  ;;  %v848_v18 = vmax.f32 %v764_v48, 0.0 }
 0x10a   : > { %v759_v60 = vadd.f32 %v2555_v28, %v758_v51  ;;  %v846_v63 = vmax.f32 %v756_v1, 0.0 }
 0x10b   : > { %v849_v61 = vmax.f32 %v767_v19, 0.0 }
 0x10c   : > { %v847_v0 = vmax.f32 %v759_v60, 0.0 }
 0x10d   : > { %v873_v29 = vpack.c.bf16 %v849_v61, %v848_v18 }
 0x10e   : > { %v872_v33 = vpack.c.bf16 %v847_v0, %v846_v63  ;;  %v1878_v39 = vpop.f32.mrb[16].mxu0 }
 0x10f   : > { %v780_v30 = vadd.f32 %v1878_v39, %v2555_v28  ;;  %v771_v45 = vpop.f32.mrb[17].mxu0 }
 0x110   : > { %v772_v57 = vadd.f32 %v2555_v28, %v771_v45  ;;  %v1879_v42 = vpop.f32.mrb[18].mxu0  ;;  %1908 = vmatprep.mubr.msk.bf16.mxu1 %vm624_vm0, %v872_v33 }
 0x111   : > { %v783_v54 = vadd.f32 %v1879_v42, %v2555_v28  ;;  %v774_v36 = vpop.f32.mrb[19].mxu0  ;;  %1909 = vmatmul.mubr.msk.bf16.gmra.mrb[12].mxu1 %vm624_vm0, %v873_v29  ;;  %v852_v1 = vmax.f32 %v780_v30, 0.0 }
 0x112   : > { %v775_v48 = vadd.f32 %v2555_v28, %v774_v36  ;;  %v850_v51 = vmax.f32 %v772_v57, 0.0 }
 0x113   : > { %v853_v19 = vmax.f32 %v783_v54, 0.0 }
 0x114   : > { %v851_v60 = vmax.f32 %v775_v48, 0.0 }
 0x115   : > { %v875_v18 = vpack.c.bf16 %v853_v19, %v852_v1 }
 0x116   : > { %v874_v61 = vpack.c.bf16 %v851_v60, %v850_v51  ;;  %v1882_v63 = vpop.f32.mrb[20].mxu0 }
 0x117   : > { %v796_v0 = vadd.f32 %v1882_v63, %v2555_v28  ;;  %v787_v39 = vpop.f32.mrb[21].mxu0 }
 0x118   : > { %v788_v45 = vadd.f32 %v2555_v28, %v787_v39  ;;  %1912 = vmatprep.mubr.msk.bf16.mxu1 %vm624_vm0, %v874_v61  ;;  %v1883_v33 = vpop.f32.mrb[22].mxu0 }
 0x119   : > { %v856_v42 = vmax.f32 %v796_v0, 0.0  ;;  %v799_v29 = vadd.f32 %v1883_v33, %v2555_v28  ;;  %1913 = vmatmul.mubr.msk.bf16.gmra.mrb[16].mxu1 %vm624_vm0, %v875_v18  ;;  %v790_v30 = vpop.f32.mrb[23].mxu0 }
 0x11a   : > { %v854_v54 = vmax.f32 %v788_v45, 0.0  ;;  %v791_v57 = vadd.f32 %v2555_v28, %v790_v30 }
 0x11b   : > { %v857_v36 = vmax.f32 %v799_v29, 0.0 }
 0x11c   : > { %v855_v48 = vmax.f32 %v791_v57, 0.0 }
 0x11d   : > { %v877_v1 = vpack.c.bf16 %v857_v36, %v856_v42 }
 0x11e   : > { %v876_v19 = vpack.c.bf16 %v855_v48, %v854_v54  ;;  %v1886_v51 = vpop.f32.mrb[24].mxu0 }
 0x11f   : > { %v812_v60 = vadd.f32 %v1886_v51, %v2555_v28  ;;  %v803_v63 = vpop.f32.mrb[25].mxu0 }
 0x120   : > { %1916 = vmatprep.mubr.msk.bf16.mxu1 %vm624_vm0, %v876_v19  ;;  %v804_v61 = vadd.f32 %v2555_v28, %v803_v63  ;;  %v1887_v0 = vpop.f32.mrb[26].mxu0 }
 0x121   : > { %1917 = vmatmul.mubr.msk.bf16.gmra.mrb[20].mxu1 %vm624_vm0, %v877_v1  ;;  %v860_v18 = vmax.f32 %v812_v60, 0.0  ;;  %v815_v39 = vadd.f32 %v1887_v0, %v2555_v28  ;;  %v806_v45 = vpop.f32.mrb[27].mxu0 }
 0x122   : > { %v858_v33 = vmax.f32 %v804_v61, 0.0  ;;  %v807_v29 = vadd.f32 %v2555_v28, %v806_v45 }
 0x123   : > { %v861_v42 = vmax.f32 %v815_v39, 0.0 }
 0x124   : > { %v859_v30 = vmax.f32 %v807_v29, 0.0 }
 0x125   : > { %v879_v54 = vpack.c.bf16 %v861_v42, %v860_v18  ;;  %v2068_v42 = vpop.permute.xlu0 %2067 }
 0x126   : > { %v878_v57 = vpack.c.bf16 %v859_v30, %v858_v33  ;;  %v1890_v36 = vpop.f32.mrb[28].mxu0  ;;  %v2070_v30 = vunpack.i.h.bf16 %v2068_v42 }
 0x127   : > { %v828_v48 = vadd.f32 %v1890_v36, %v2555_v28  ;;  %v819_v19 = vpop.f32.mrb[29].mxu0 }
 0x128   : > { %1920 = vmatprep.mubr.msk.bf16.mxu1 %vm624_vm0, %v878_v57  ;;  %v820_v51 = vadd.f32 %v2555_v28, %v819_v19  ;;  %v1891_v1 = vpop.f32.mrb[30].mxu0  ;;  %v2069_v57 = vunpack.i.l.bf16 %v2068_v42 }
 0x129   : > { %1921 = vmatmul.mubr.msk.bf16.gmra.mrb[24].mxu1 %vm624_vm0, %v879_v54  ;;  %v864_v60 = vmax.f32 %v828_v48, 0.0  ;;  %v831_v63 = vadd.f32 %v1891_v1, %v2555_v28  ;;  %v822_v61 = vpop.f32.mrb[31].mxu0  ;;  %v506_v54 = vmul.f32 %v2070_v30, %v346_v23  ;;  %v2073_v48 = vpop.permute.xlu0 %2072  ;;  %v2080_v23 = vunpack.i.h.bf16 %v2078_v10 }
 0x12a   : > { %v862_v0 = vmax.f32 %v820_v51, 0.0  ;;  %v823_v39 = vadd.f32 %v2555_v28, %v822_v61  ;;  %v505_v36 = vmul.f32 %v2069_v57, %v345_v22  ;;  %v2075_v19 = vunpack.i.h.bf16 %v2073_v48 }
 0x12b   : > { %v865_v18 = vmax.f32 %v831_v63, 0.0  ;;  %v2074_v28 = vunpack.i.l.bf16 %v2073_v48  ;;  %v2079_v61 = vunpack.i.l.bf16 %v2078_v10  ;;  %v508_v2 = vmul.f32 %v2080_v23, %v348_v25 }
 0x12c   : > { %v863_v45 = vmax.f32 %v823_v39, 0.0  ;;  %v1928_v51 = vpack.c.bf16 %v506_v54, %v505_v36  ;;  %v490_v1 = vmul.f32 %v2075_v19, %v330_v21  ;;  %v2083_v21 = vpop.permute.xlu1 %2082 }
 0x12d   : > { %v881_v33 = vpack.c.bf16 %v865_v18, %v864_v60  ;;  %v489_v60 = vmul.f32 %v2074_v28, %v329_v20  ;;  %v507_v20 = vmul.f32 %v2079_v61, %v347_v24  ;;  %v2084_v39 = vunpack.i.l.bf16 %v2083_v21  ;;  %v2088_v42 = vpop.permute.xlu0 %2087 }
 0x12e   : > { %v880_v29 = vpack.c.bf16 %v863_v45, %v862_v0  ;;  %1930 = vmatprep.subr.msk.bf16.mxu0 %vm2615_vm2, %v1928_v51  ;;  %v2085_v0 = vunpack.i.h.bf16 %v2083_v21  ;;  %v2090_v24 = vunpack.i.h.bf16 %v2088_v42  ;;  %v2089_v25 = vunpack.i.l.bf16 %v2088_v42 }
 0x12f   : > { %v1931_v22 = vpack.c.bf16 %v490_v1, %v489_v60  ;;  %v1934_v18 = vpack.c.bf16 %v508_v2, %v507_v20 }
 0x130   : > { %1924 = vmatprep.mubr.msk.bf16.mxu1 %vm624_vm0, %v880_v29  ;;  %v492_v45 = vmul.f32 %v2085_v0, %v332_v27  ;;  %v2093_v11 = vpop.permute.xlu1 %2092  ;;  %v510_v54 = vmul.f32 %v2090_v24, %v350_v32  ;;  %v509_v3 = vmul.f32 %v2089_v25, %v349_v31 }
 0x131   : > { %1925 = vmatmul.mubr.msk.bf16.gmra.mrb[28].mxu1 %vm624_vm0, %v881_v33  ;;  %1933 = vmatpush3.bf16.xpose.msk.msra.mxu0 %vm2615_vm2, %v1931_v22  ;;  %v491_v33 = vmul.f32 %v2084_v39, %v331_v26  ;;  %v2095_v30 = vunpack.i.h.bf16 %v2093_v11  ;;  %v2094_v57 = vunpack.i.l.bf16 %v2093_v11  ;;  %v2098_v36 = vpop.permute.xlu0 %2097 }
 0x132   : > { %1936 = vmatprep.subr.msk.bf16.mxu0 %vm2615_vm2, %v1934_v18  ;;  %v1940_v19 = vpack.c.bf16 %v510_v54, %v509_v3  ;;  %v2100_v51 = vunpack.i.h.bf16 %v2098_v36  ;;  %v2099_v1 = vunpack.i.l.bf16 %v2098_v36  ;;  %v2878_v36 = vunpack.c.l.bf16 %v2430_v17  ;;  %v2710_v17 = vld [vmem:[%s2869_s6] sm:$0xff] }
 0x133   : > { %v1937_v29 = vpack.c.bf16 %v492_v45, %v491_v33  ;;  %v494_v26 = vmul.f32 %v2095_v30, %v334_v35  ;;  %v493_v27 = vmul.f32 %v2094_v57, %v333_v34  ;;  %1854 = vmatprep.mubr.msk.f32.mxu1 %vm1146_vm1, %v2710_v17 }
 0x134   : > { %v2103_v48 = vpop.permute.xlu1 %2102  ;;  %v512_v12 = vmul.f32 %v2100_v51, %v352_v38  ;;  %v511_v31 = vmul.f32 %v2099_v1, %v351_v37 }
 0x135   : > { %v1943_v28 = vpack.c.bf16 %v494_v26, %v493_v27  ;;  %v2105_v60 = vunpack.i.h.bf16 %v2103_v48  ;;  %v2104_v10 = vunpack.i.l.bf16 %v2103_v48  ;;  %v2108_v22 = vpop.permute.xlu0 %2107  ;;  %v2880_v48 = vunpack.c.l.bf16 %v2390_v9  ;;  %v2719_v9 = vld [vmem:[%s2868_s5] ss:$0 sm:$0xff] }
 0x136   : > { %v1946_v34 = vpack.c.bf16 %v512_v12, %v511_v31  ;;  %v2110_v38 = vunpack.i.h.bf16 %v2108_v22  ;;  %v2109_v61 = vunpack.i.l.bf16 %v2108_v22 }
 0x137   : > { %v496_v4 = vmul.f32 %v2105_v60, %v336_v41  ;;  %v495_v32 = vmul.f32 %v2104_v10, %v335_v40 }
 0x138   : > { %v2113_v23 = vpop.permute.xlu1 %2112  ;;  %v514_v2 = vmul.f32 %v2110_v38, %v354_v44  ;;  %v513_v41 = vmul.f32 %v2109_v61, %v353_v43 }
 0x139   : > { %1939 = vmatpush3.bf16.xpose.msk.msra.mxu0 %vm2615_vm2, %v1937_v29  ;;  %v1949_v35 = vpack.c.bf16 %v496_v4, %v495_v32  ;;  %v2115_v13 = vunpack.i.h.bf16 %v2113_v23  ;;  %v2114_v37 = vunpack.i.l.bf16 %v2113_v23  ;;  %v2118_v0 = vpop.permute.xlu0 %2117 }
 0x13a   : > { %1942 = vmatprep.subr.msk.bf16.mxu0 %vm2615_vm2, %v1940_v19  ;;  %v1952_v20 = vpack.c.bf16 %v514_v2, %v513_v41  ;;  %v2120_v44 = vunpack.i.h.bf16 %v2118_v0  ;;  %v2119_v18 = vunpack.i.l.bf16 %v2118_v0 }
 0x13b   : > { %v498_v5 = vmul.f32 %v2115_v13, %v338_v47  ;;  %v497_v40 = vmul.f32 %v2114_v37, %v337_v46 }
 0x13c   : > { %v2123_v39 = vpop.permute.xlu1 %2122  ;;  %v516_v45 = vmul.f32 %v2120_v44, %v356_v50  ;;  %v515_v47 = vmul.f32 %v2119_v18, %v355_v49 }
 0x13d   : > { %v1955_v21 = vpack.c.bf16 %v498_v5, %v497_v40  ;;  %v2125_v14 = vunpack.i.h.bf16 %v2123_v39  ;;  %v2124_v43 = vunpack.i.l.bf16 %v2123_v39  ;;  %v2128_v42 = vpop.permute.xlu0 %2127 }
 0x13e   : > { %v1958_v33 = vpack.c.bf16 %v516_v45, %v515_v47  ;;  %v2130_v50 = vunpack.i.h.bf16 %v2128_v42  ;;  %v2129_v24 = vunpack.i.l.bf16 %v2128_v42 }
 0x13f   : > { %v500_v6 = vmul.f32 %v2125_v14, %v340_v53  ;;  %v499_v46 = vmul.f32 %v2124_v43, %v339_v52 }
 0x140   : > { %v2133_v11 = vpop.permute.xlu1 %2132  ;;  %v518_v25 = vmul.f32 %v2130_v50, %v358_v56  ;;  %v517_v53 = vmul.f32 %v2129_v24, %v357_v55 }
 0x141   : > { %1945 = vmatpush3.bf16.xpose.msk.msra.mxu0 %vm2615_vm2, %v1943_v28  ;;  %v1961_v29 = vpack.c.bf16 %v500_v6, %v499_v46  ;;  %v2135_v15 = vunpack.i.h.bf16 %v2133_v11  ;;  %v2134_v49 = vunpack.i.l.bf16 %v2133_v11  ;;  %v2138_v54 = vpop.permute.xlu0 %2137 }
 0x142   : > { %1948 = vmatprep.subr.msk.bf16.mxu0 %vm2615_vm2, %v1946_v34  ;;  %v1964_v30 = vpack.c.bf16 %v518_v25, %v517_v53  ;;  %v2140_v56 = vunpack.i.h.bf16 %v2138_v54  ;;  %v2139_v26 = vunpack.i.l.bf16 %v2138_v54 }
 0x143   : > { %v502_v7 = vmul.f32 %v2135_v15, %v342_v59  ;;  %v501_v52 = vmul.f32 %v2134_v49, %v341_v58 }
 0x144   : > { %v2143_v3 = vpop.permute.xlu1 %2142  ;;  %v520_v27 = vmul.f32 %v2140_v56, %v360_v62  ;;  %v519_v59 = vmul.f32 %v2139_v26, %v2878_v36  ;;  %v2247_v62 = vmov 1.0  }
 0x145   : > { %v1967_v57 = vpack.c.bf16 %v502_v7, %v501_v52  ;;  %v2145_v16 = vunpack.i.h.bf16 %v2143_v3  ;;  %v2144_v55 = vunpack.i.l.bf16 %v2143_v3  ;;  %1820 = vmatprep.mubr.msk.f32.mxu0 %vm1146_vm1, %v2247_v62 }
 0x146   : > { %v1970_v28 = vpack.c.bf16 %v520_v27, %v519_v59 }
 0x147   : > { %v504_v58 = vmul.f32 %v2145_v16, %v2879_v8  ;;  %v503_v19 = vmul.f32 %v2144_v55, %v2880_v48 }
 0x149   : > { %1951 = vmatpush3.bf16.xpose.msk.msra.mxu0 %vm2615_vm2, %v1949_v35  ;;  %v1973_v51 = vpack.c.bf16 %v504_v58, %v503_v19 }
 0x14a   : > { %1954 = vmatprep.subr.msk.bf16.mxu0 %vm2615_vm2, %v1952_v20 }
 0x151   : > { %1957 = vmatpush3.bf16.xpose.msk.msra.mxu0 %vm2615_vm2, %v1955_v21 }
 0x152   : > { %1960 = vmatprep.subr.msk.bf16.mxu0 %vm2615_vm2, %v1958_v33 }
 0x159   : > { %1963 = vmatpush3.bf16.xpose.msk.msra.mxu0 %vm2615_vm2, %v1961_v29 }
 0x15a   : > { %1966 = vmatprep.subr.msk.bf16.mxu0 %vm2615_vm2, %v1964_v30 }
 0x161   : > { %1969 = vmatpush3.bf16.xpose.msk.msra.mxu0 %vm2615_vm2, %v1967_v57 }
 0x162   : > { %1972 = vmatprep.subr.msk.bf16.mxu0 %vm2615_vm2, %v1970_v28 }
 0x169   : > { %1975 = vmatpush3.bf16.xpose.msk.msra.mxu0 %vm2615_vm2, %v1973_v51 }
 0x170   : > { %1821 = vmatmul.mubr.msk.f32.vlgmr.msra.gmra.mrb[32].mxu0 %vm1146_vm1, %v2247_v62 }
 0x1cc   : > { %v1898_v1 = vpop.f32.mrb[0].mxu1 }
 0x1cd   : > { %v996_v60 = vadd.f32 %v1898_v1, %v2719_v9  ;;  %v987_v10 = vpop.f32.mrb[1].mxu1 }
 0x1ce   : > { %v988_v12 = vadd.f32 %v2719_v9, %v987_v10  ;;  %v1899_v31 = vpop.f32.mrb[2].mxu1 }
 0x1cf   : > { %v999_v4 = vadd.f32 %v1899_v31, %v2719_v9  ;;  %v990_v32 = vpop.f32.mrb[3].mxu1  ;;  %v1116_v35 = vmax.f32 %v996_v60, 0.0 }
 0x1d0   : > { %v991_v34 = vadd.f32 %v2719_v9, %v990_v32  ;;  %v1114_v23 = vmax.f32 %v988_v12, 0.0 }
 0x1d1   : > { %v1117_v22 = vmax.f32 %v999_v4, 0.0 }
 0x1d2   : > { %v1115_v38 = vmax.f32 %v991_v34, 0.0 }
 0x1d3   : > { %v2725_v61 = vpack.c.bf16 %v1117_v22, %v1116_v35 }
 0x1d4   : > { %v2727_v13 = vpack.c.bf16 %v1115_v38, %v1114_v23  ;;  %v1902_v37 = vpop.f32.mrb[4].mxu1 }
 0x1d5   : > { %v1012_v2 = vadd.f32 %v1902_v37, %v2719_v9  ;;  %v1003_v41 = vpop.f32.mrb[5].mxu1 }
 0x1d6   : > { %v1004_v5 = vadd.f32 %v2719_v9, %v1003_v41  ;;  %v1903_v40 = vpop.f32.mrb[6].mxu1 }
 0x1d7   : > { %v1015_v20 = vadd.f32 %v1903_v40, %v2719_v9  ;;  %v1006_v21 = vpop.f32.mrb[7].mxu1  ;;  %v1120_v39 = vmax.f32 %v1012_v2, 0.0 }
 0x1d8   : > { %v1007_v0 = vadd.f32 %v2719_v9, %v1006_v21  ;;  %v1118_v18 = vmax.f32 %v1004_v5, 0.0 }
 0x1d9   : > { %v1121_v44 = vmax.f32 %v1015_v20, 0.0 }
 0x1da   : > { %v1119_v14 = vmax.f32 %v1007_v0, 0.0 }
 0x1db   : > { %v2733_v43 = vpack.c.bf16 %v1121_v44, %v1120_v39 }
 0x1dc   : > { %v2735_v45 = vpack.c.bf16 %v1119_v14, %v1118_v18  ;;  %v1906_v47 = vpop.f32.mrb[8].mxu1 }
 0x1dd   : > { %v1028_v6 = vadd.f32 %v1906_v47, %v2719_v9  ;;  %v1019_v46 = vpop.f32.mrb[9].mxu1 }
 0x1de   : > { %v1020_v33 = vadd.f32 %v2719_v9, %v1019_v46  ;;  %v1907_v29 = vpop.f32.mrb[10].mxu1 }
 0x1df   : > { %v1031_v42 = vadd.f32 %v1907_v29, %v2719_v9  ;;  %v1022_v11 = vpop.f32.mrb[11].mxu1  ;;  %v1124_v24 = vmax.f32 %v1028_v6, 0.0 }
 0x1e0   : > { %v1023_v50 = vadd.f32 %v2719_v9, %v1022_v11  ;;  %v1122_v49 = vmax.f32 %v1020_v33, 0.0 }
 0x1e1   : > { %v1125_v15 = vmax.f32 %v1031_v42, 0.0 }
 0x1e2   : > { %v1123_v25 = vmax.f32 %v1023_v50, 0.0 }
 0x1e3   : > { %v2741_v53 = vpack.c.bf16 %v1125_v15, %v1124_v24 }
 0x1e4   : > { %v2743_v7 = vpack.c.bf16 %v1123_v25, %v1122_v49  ;;  %v1910_v52 = vpop.f32.mrb[12].mxu1 }
 0x1e5   : > { %v1044_v30 = vadd.f32 %v1910_v52, %v2719_v9  ;;  %v1035_v57 = vpop.f32.mrb[13].mxu1 }
 0x1e6   : > { %v1036_v54 = vadd.f32 %v2719_v9, %v1035_v57  ;;  %v1911_v3 = vpop.f32.mrb[14].mxu1 }
 0x1e7   : > { %v1047_v56 = vadd.f32 %v1911_v3, %v2719_v9  ;;  %v1038_v26 = vpop.f32.mrb[15].mxu1  ;;  %v1128_v55 = vmax.f32 %v1044_v30, 0.0 }
 0x1e8   : > { %v1039_v16 = vadd.f32 %v2719_v9, %v1038_v26  ;;  %v1126_v36 = vmax.f32 %v1036_v54, 0.0 }
 0x1e9   : > { %v1129_v27 = vmax.f32 %v1047_v56, 0.0 }
 0x1ea   : > { %v1127_v59 = vmax.f32 %v1039_v16, 0.0 }
 0x1eb   : > { %v2749_v8 = vpack.c.bf16 %v1129_v27, %v1128_v55 }
 0x1ec   : > { %v2751_v58 = vpack.c.bf16 %v1127_v59, %v1126_v36  ;;  %v1914_v48 = vpop.f32.mrb[16].mxu1 }
 0x1ed   : > { %v1060_v19 = vadd.f32 %v1914_v48, %v2719_v9  ;;  %v1051_v28 = vpop.f32.mrb[17].mxu1 }
 0x1ee   : > { %v1052_v51 = vadd.f32 %v2719_v9, %v1051_v28  ;;  %v1915_v62 = vpop.f32.mrb[18].mxu1 }
 0x1ef   : > { %v1063_v1 = vadd.f32 %v1915_v62, %v2719_v9  ;;  %v1054_v60 = vpop.f32.mrb[19].mxu1  ;;  %v1132_v12 = vmax.f32 %v1060_v19, 0.0  ;;  %v1495_v19 = vlaneseq }
 0x1f0   : > { %v1055_v10 = vadd.f32 %v2719_v9, %v1054_v60  ;;  %v1130_v4 = vmax.f32 %v1052_v51, 0.0 }
 0x1f1   : > { %v1133_v31 = vmax.f32 %v1063_v1, 0.0  ;;  %vm1529_vm3 = vcmp.lt.s32.totalorder %v1495_v19, 256 }
 0x1f2   : > { %v1131_v32 = vmax.f32 %v1055_v10, 0.0 }
 0x1f3   : > { %v1982_v34 = vpack.c.bf16 %v1133_v31, %v1132_v12 }
 0x1f4   : > { %v1976_v35 = vpack.c.bf16 %v1131_v32, %v1130_v4  ;;  %v1918_v22 = vpop.f32.mrb[20].mxu1 }
 0x1f5   : > { %v1076_v23 = vadd.f32 %v1918_v22, %v2719_v9  ;;  %v1067_v38 = vpop.f32.mrb[21].mxu1 }
 0x1f6   : > { %v1068_v37 = vadd.f32 %v2719_v9, %v1067_v38  ;;  %1978 = vmatprep.subr.msk.bf16.mxu1 %vm2615_vm2, %v1976_v35  ;;  %v1919_v2 = vpop.f32.mrb[22].mxu1 }
 0x1f7   : > { %v1136_v41 = vmax.f32 %v1076_v23, 0.0  ;;  %v1079_v5 = vadd.f32 %v1919_v2, %v2719_v9  ;;  %1981 = vmatpush3.bf16.xpose.msk.msra.mxu1 %vm2615_vm2, %v2727_v13  ;;  %v1070_v40 = vpop.f32.mrb[23].mxu1 }
 0x1f8   : > { %v1134_v20 = vmax.f32 %v1068_v37, 0.0  ;;  %v1071_v21 = vadd.f32 %v2719_v9, %v1070_v40  ;;  %1984 = vmatprep.subr.msk.bf16.mxu1 %vm2615_vm2, %v1982_v34 }
 0x1f9   : > { %v1137_v0 = vmax.f32 %v1079_v5, 0.0 }
 0x1fa   : > { %v1135_v39 = vmax.f32 %v1071_v21, 0.0 }
 0x1fb   : > { %v1994_v44 = vpack.c.bf16 %v1137_v0, %v1136_v41 }
 0x1fc   : > { %v1988_v18 = vpack.c.bf16 %v1135_v39, %v1134_v20  ;;  %v1922_v14 = vpop.f32.mrb[24].mxu1 }
 0x1fd   : > { %v1092_v47 = vadd.f32 %v1922_v14, %v2719_v9  ;;  %v1083_v6 = vpop.f32.mrb[25].mxu1 }
 0x1fe   : > { %v1084_v46 = vadd.f32 %v2719_v9, %v1083_v6  ;;  %v1923_v33 = vpop.f32.mrb[26].mxu1 }
 0x1ff   : > { %1987 = vmatpush3.bf16.xpose.msk.msra.mxu1 %vm2615_vm2, %v2725_v61  ;;  %v1140_v13 = vmax.f32 %v1092_v47, 0.0  ;;  %v1095_v29 = vadd.f32 %v1923_v33, %v2719_v9  ;;  %v1086_v42 = vpop.f32.mrb[27].mxu1 }
 0x200   : > { %1990 = vmatprep.subr.msk.bf16.mxu1 %vm2615_vm2, %v1988_v18  ;;  %v1138_v11 = vmax.f32 %v1084_v46, 0.0  ;;  %v1087_v50 = vadd.f32 %v2719_v9, %v1086_v42 }
 0x201   : > { %v1141_v24 = vmax.f32 %v1095_v29, 0.0 }
 0x202   : > { %v1139_v15 = vmax.f32 %v1087_v50, 0.0 }
 0x203   : > { %v2006_v49 = vpack.c.bf16 %v1141_v24, %v1140_v13 }
 0x204   : > { %v2000_v25 = vpack.c.bf16 %v1139_v15, %v1138_v11  ;;  %v1926_v52 = vpop.f32.mrb[28].mxu1 }
 0x205   : > { %v1108_v30 = vadd.f32 %v1926_v52, %v2719_v9  ;;  %v1099_v57 = vpop.f32.mrb[29].mxu1 }
 0x206   : > { %v1100_v61 = vadd.f32 %v2719_v9, %v1099_v57  ;;  %v1927_v54 = vpop.f32.mrb[30].mxu1 }
 0x207   : > { %1993 = vmatpush3.bf16.xpose.msk.msra.mxu1 %vm2615_vm2, %v2735_v45  ;;  %v1144_v3 = vmax.f32 %v1108_v30, 0.0  ;;  %v1111_v56 = vadd.f32 %v1927_v54, %v2719_v9  ;;  %v1102_v26 = vpop.f32.mrb[31].mxu1 }
 0x208   : > { %1996 = vmatprep.subr.msk.bf16.mxu1 %vm2615_vm2, %v1994_v44  ;;  %v1142_v16 = vmax.f32 %v1100_v61, 0.0  ;;  %v1103_v55 = vadd.f32 %v2719_v9, %v1102_v26 }
 0x209   : > { %v1145_v27 = vmax.f32 %v1111_v56, 0.0 }
 0x20a   : > { %v1143_v36 = vmax.f32 %v1103_v55, 0.0 }
 0x20b   : > { %v2018_v59 = vpack.c.bf16 %v1145_v27, %v1144_v3 }
 0x20c   : > { %v2012_v48 = vpack.c.bf16 %v1143_v36, %v1142_v16 }
 0x20f   : > { %1999 = vmatpush3.bf16.xpose.msk.msra.mxu1 %vm2615_vm2, %v2733_v43 }
 0x210   : > { %2002 = vmatprep.subr.msk.bf16.mxu1 %vm2615_vm2, %v2000_v25 }
 0x217   : > { %2005 = vmatpush3.bf16.xpose.msk.msra.mxu1 %vm2615_vm2, %v2743_v7 }
 0x218   : > { %2008 = vmatprep.subr.msk.bf16.mxu1 %vm2615_vm2, %v2006_v49 }
 0x21f   : > { %2011 = vmatpush3.bf16.xpose.msk.msra.mxu1 %vm2615_vm2, %v2741_v53  ;;  %v2248_v53 = vmov 1966171168  }
 0x220   : > { %2014 = vmatprep.subr.msk.bf16.mxu1 %vm2615_vm2, %v2012_v48  ;;  %v1493_v7 = vunpack.c.l.s4 %v2248_v53 }
 0x222   : > { %v1494_v28 = vunpack.c.0.s8 %v1493_v7 }
 0x227   : > { %2017 = vmatpush3.bf16.xpose.msk.msra.mxu1 %vm2615_vm2, %v2751_v58  ;;  %v1496_v58 = vshrl.u32 %v1495_v19, 7 }
 0x228   : > { %2020 = vmatprep.subr.msk.bf16.mxu1 %vm2615_vm2, %v2018_v59 }
 0x229   : > { %v1497_v51 = vsub.s32 %v1494_v28, %v1496_v58 }
 0x22f   : > { %2023 = vmatpush3.bf16.xpose.msk.msra.mxu1 %vm2615_vm2, %v2749_v8  ;;  %v1488_v8 = vld [vmem:[%s295_s8] sm:$0x3] }
 0x236   : > { %1855 = vmatmul.mubr.msk.f32.vlgmr.msra.gmra.mrb[32].mxu1 %vm1146_vm1, %v2710_v17 }
 0x243   : > { %v1312_v9 = vpop.f32.mrb[32].mxu0 }
 0x244   : > { %v1314_v43 = vpop.f32.mrb[33].mxu0 }
 0x245   : > { %v1491_v45 = vcombine.low %v1312_v9, %v1314_v43 }
 0x247   : > { %v1498_v62 = vrot.slane %v1491_v45, %v1497_v51 }
 0x249   : > { %v1505_v63 = vrot.slane %v1498_v62, %v1497_v51 }
 0x24b   : > { %v1507_v10 = vadd.f32 %v1505_v63, %v1488_v8 }
 0x309   : > { %v1483_v17 = vpop.f32.mrb[32].mxu1 }
 0x30a   : > { %v1485_v1 = vpop.f32.mrb[33].mxu1 }
 0x30b   : > { %v1510_v60 = vcombine.low %v1483_v17, %v1485_v1 }
 0x30d   : > { %v1517_v12 = vrot.slane %v1510_v60, %v1497_v51 }
 0x30f   : > { %v1524_v31 = vrot.slane %v1517_v12, %v1497_v51 }
 0x311   : > { %v1526_v4 = vadd.f32 %v1524_v31, %v1507_v10 }
 0x313   : > { %1531 = vst.msk [vmem:[%s285_s13] sm:$0x3] %vm1529_vm3, %v1526_v4 }
 0x314   : > { %2195 = shalt.err (!%p2192_p4)
}
 0x315   : > { %s2196_s15 = scalar_lea.hbm %s2821_s17, 32  ;;  %s2200_s8 = scalar_lea.hbm %s2870_s7, 64 }
 0x316   : > { %p2197_p7 = scmp.ne.s32.totalorder %s2821_s17, %s2196_s15  ;;  %p2201_p10 = scmp.lt.u32.totalorder %s2821_s17, %s2870_s7 }
 0x317   : > { %p2202_p11 = scmp.lt.u32.totalorder %s2200_s8, %s2196_s15  ;;  %p2204_p13 = scmp.lt.u32.totalorder %s2196_s15, %s2821_s17 }
 0x318   : > { %p2198_p8 = pnand %p2197_p7, %p2328_p5 }
 0x319   : > { %p2203_p12 = por %p2202_p11, %p2201_p10 }
 0x31a   : > { %p2199_p9 = pneg %p2198_p8 }
 0x31b   : > { %p2205_p0 = por %p2204_p13, %p2203_p12 }
 0x31d   : > { %p2206_p1 = pnand %p2205_p0, %p2199_p9 }
 0x31f   : > { %2209 = shalt.err (!%p2206_p1)
}
 0x320   : > { %2024 = dma.vmem_to_hbm [thread:$0]  (%p2328_p5), %s2823_s14, 32, %s2821_s17, %s1533_s18  }
 0x321 PF: > { %p2030_p2 = scmp.ge.s32.totalorder %s2244_s27, 2  ;;  %s1559_s28 = sand.u32 1, %s2232_s24  }
 0x322   : > { %s1560_s16 = scalar_lea.sflag [#allocation3], %s1559_s28 }
 0x323   : > { %p2027_p3 = pnand %p2030_p2, %p2332_p6 }
 0x325   : > { %2227 = dma.done.wait (!%p2027_p3), %s1560_s16, 32  }
 0x326   : > { %2229 = vsyncadd (!%p2027_p3), %s1560_s16, 4294967264  ;;  %p17_p4 = scmp.ge.s32.totalorder %s2315_s30, 4   ;;  %s2881_s24 = smov %s2236_s25 }
 0x327   : > { %s2882_s25 = smov %s2240_s26  ;;  %s2883_s26 = smov %s2326_s10 }
 0x328   : > { %s2884_s27 = smov %s2315_s30  ;;  %19 = sbr.rel (!%p17_p4) target bundleno = 3 (0x3), region = 86 }
 0x32f   :  { %1565 = vsyncpa [#allocation3], 1 }
 0x330   :  { %1567 = vsyncpa [#allocation3 + $0x1], 1 }

</bundles_post_ra>
